<compile_context>
chip_gen: v6e
topology: v6e:2x2x1
jax: 0.10.0
libtpu: 0.0.40
codegen_flags: <defaults>
</compile_context>

<pallas_src>
import functools

import numpy as np
import jax
import jax.numpy as jnp
from jax import lax
from jax.experimental import pallas as pl
from jax.experimental.pallas import tpu as pltpu

_REV_MATMUL_MIN_WIDTH = 8  # below this, per-column stores are cheaper/simpler


def _linear_relu(x_dt, wl_ref, bl_ref, mxu_dtype):
    """relu(Wl @ x + bl) for one batch element; x_dt: (D, T) f32, channels on sublanes."""
    z = jnp.dot(wl_ref[...], x_dt.astype(mxu_dtype),
                preferred_element_type=jnp.float32) + bl_ref[...]
    return jnp.maximum(z, 0.0)


def _reverse_lanes(a):
    """Reverse the last (lane) axis via a tiny 0/1 anti-diagonal matmul.

    Exact in any dtype (every product is x*1 or x*0, f32 accumulate), keeps the
    reflection edges off the vector-store slot (no masked per-column stores), and
    costs one (D, P) x (P, P) MXU op with P < K.
    """
    p = a.shape[-1]
    ii = lax.broadcasted_iota(jnp.int32, (p, p), 0)
    jj = lax.broadcasted_iota(jnp.int32, (p, p), 1)
    antidiag = (ii + jj == p - 1).astype(jnp.float32)
    rev = jnp.dot(a.astype(jnp.float32), antidiag,
                  preferred_element_type=jnp.float32)
    return rev.astype(a.dtype)


def _stats_kernel(x_ref, wl_ref, bl_ref, s1_ref, s2_ref, *, mxu_dtype):
    """Accumulate per-channel sum / sum-of-squares of relu(linear(x)) over the batch."""
    b = pl.program_id(0)

    @pl.when(b == 0)
    def _():
        s1_ref[...] = jnp.zeros_like(s1_ref)
        s2_ref[...] = jnp.zeros_like(s2_ref)

    z = _linear_relu(x_ref[0], wl_ref, bl_ref, mxu_dtype)            # (D, T) f32
    s1_ref[...] += jnp.sum(z, axis=1, keepdims=True)
    s2_ref[...] += jnp.sum(z * z, axis=1, keepdims=True)


def _apply_kernel(x_ref, wl_ref, bl_ref, scale_ref, shift_ref, wcf_ref, bc_ref,
                  o_ref, zp_ref, *im2col_scratch, K, mxu_dtype, use_im2col):
    # x_ref / o_ref: (1, D, T) block of the (B, D, T) arrays (NCL layout)
    # wl_ref:  (D, D)      linear weight in mxu_dtype
    # wcf_ref: (D, K*D)    conv weight flattened: wcf[o, k*D + i] = Wc[o, i, k]
    # bl/scale/shift/bc:   (D, 1) f32 columns
    # zp_ref:  (D, T+K-1)  mxu_dtype scratch (reflection-padded activation)
    _, D, T = x_ref.shape
    pad_l = K // 2 - 1
    pad_r = K // 2

    z = _linear_relu(x_ref[0], wl_ref, bl_ref, mxu_dtype)            # (D, T) f32
    # BatchNorm fold: zn = (z - mean) * inv * gamma + beta == z * scale + shift.
    zn = (z * scale_ref[...] + shift_ref[...]).astype(mxu_dtype)     # cast once

    # ---- ReflectionPad1d((K//2-1, K//2)) into the padded scratch slab ----
    zp_ref[:, pad_l:pad_l + T] = zn
    if pad_l > 0:
        if pad_l >= _REV_MATMUL_MIN_WIDTH:
            zp_ref[:, :pad_l] = _reverse_lanes(zn[:, 1:1 + pad_l])
        else:
            for j in range(pad_l):
                zp_ref[:, j:j + 1] = zn[:, pad_l - j:pad_l - j + 1]
    if pad_r > 0:
        if pad_r >= _REV_MATMUL_MIN_WIDTH:
            zp_ref[:, pad_l + T:] = _reverse_lanes(zn[:, T - 1 - pad_r:T - 1])
        else:
            for j in range(pad_r):
                zp_ref[:, pad_l + T + j:pad_l + T + j + 1] = zn[:, T - 2 - j:T - 1 - j]

    # ---- Conv1d(D, D, K) ----
    if use_im2col:
        # Small D: one K*D-deep matmul keeps the MXU contraction full.
        zcol_ref, = im2col_scratch                                   # (K*D, T)
        for k in range(K):
            zcol_ref[k * D:(k + 1) * D, :] = zp_ref[:, k:k + T]
        y = jnp.dot(wcf_ref[...], zcol_ref[...],
                    preferred_element_type=jnp.float32)              # (D, T) f32
    else:
        # D >= 128: per-tap accumulation — the D-deep contraction already fills the
        # MXU and avoids the K x activation-sized im2col scratch and slab copies.
        # (K is a compile-time constant; the unrolled taps stay visible to the
        # LLO scheduler.)
        y = jnp.zeros((D, T), jnp.float32)
        for k in range(K):
            y = y + jnp.dot(wcf_ref[:, k * D:(k + 1) * D], zp_ref[:, k:k + T],
                            preferred_element_type=jnp.float32)

    # Conv bias + residual (residual read straight from the f32 input block).
    o_ref[0] = x_ref[0] + y + bc_ref[...]


def seqclr_conv_residual_block(x, params, K, mxu_dtype=jnp.bfloat16):
    """x: (B, D, T) float32 (PyTorch NCL layout). Returns (B, D, T) float32."""
    Wl, bl, gamma, beta, Wc, bc = params
    B, D, T = x.shape
    assert K % 2 == 0, "ReflectionPad1d((K//2-1, K//2)) assumes even K"
    pad_l, pad_r = K // 2 - 1, K // 2
    assert max(pad_l, pad_r) < T, "reflection pad must be < temporal length"

    # Weights pre-cast to the MXU operand dtype (halves weight DMA for bf16, no
    # in-kernel weight casts).  Conv weight flattened so wcf[:, k*D:(k+1)*D] == Wc[:,:,k].
    wl_m = Wl.astype(mxu_dtype)
    wcf_m = jnp.transpose(Wc, (0, 2, 1)).reshape(D, K * D).astype(mxu_dtype)
    bl_c = bl.reshape(D, 1)
    bc_c = bc.reshape(D, 1)

    # ---- pass 1: BN batch statistics (sum / sumsq accumulated across the grid) ----
    s1, s2 = pl.pallas_call(
        functools.partial(_stats_kernel, mxu_dtype=mxu_dtype),
        out_shape=(jax.ShapeDtypeStruct((D, 1), jnp.float32),
                   jax.ShapeDtypeStruct((D, 1), jnp.float32)),
        grid=(B,),
        in_specs=[pl.BlockSpec((1, D, T), lambda b: (b, 0, 0)),
                  pl.BlockSpec((D, D), lambda b: (0, 0)),
                  pl.BlockSpec((D, 1), lambda b: (0, 0))],
        out_specs=(pl.BlockSpec((D, 1), lambda b: (0, 0)),
                   pl.BlockSpec((D, 1), lambda b: (0, 0))),
        compiler_params=pltpu.CompilerParams(dimension_semantics=("arbitrary",)),
    )(x, wl_m, bl_c)

    # BN finalize on tiny (D, 1) tensors: fold mean/var/gamma/beta into scale/shift.
    # (Single-pass biased variance, clamped at 0; eps = 1e-5 like nn.BatchNorm1d.)
    n = float(B * T)
    mean = s1 / n
    var = jnp.maximum(s2 / n - mean * mean, 0.0)
    inv = lax.rsqrt(var + 1e-5)
    scale = inv * gamma.reshape(D, 1)
    shift = beta.reshape(D, 1) - mean * scale

    # ---- pass 2: normalize + reflection pad + conv + residual, one batch per step ----
    use_im2col = D < 128
    scratch = [pltpu.VMEM((D, T + K - 1), mxu_dtype)]
    if use_im2col:
        scratch.append(pltpu.VMEM((K * D, T), mxu_dtype))

    return pl.pallas_call(
        functools.partial(_apply_kernel, K=K, mxu_dtype=mxu_dtype,
                          use_im2col=use_im2col),
        out_shape=jax.ShapeDtypeStruct((B, D, T), jnp.float32),
        grid=(B,),
        in_specs=[pl.BlockSpec((1, D, T), lambda b: (b, 0, 0)),
                  pl.BlockSpec((D, D), lambda b: (0, 0)),
                  pl.BlockSpec((D, 1), lambda b: (0, 0)),
                  pl.BlockSpec((D, 1), lambda b: (0, 0)),
                  pl.BlockSpec((D, 1), lambda b: (0, 0)),
                  pl.BlockSpec((D, K * D), lambda b: (0, 0)),
                  pl.BlockSpec((D, 1), lambda b: (0, 0))],
        out_specs=pl.BlockSpec((1, D, T), lambda b: (b, 0, 0)),
        scratch_shapes=scratch,
        compiler_params=pltpu.CompilerParams(dimension_semantics=("parallel",)),
    )(x, wl_m, bl_c, scale, shift, wcf_m, bc_c)


def reference(x, params, K):
    """Pure-JAX reference matching the PyTorch forward (training-mode BN)."""
    Wl, bl, gamma, beta, Wc, bc = params
    B, D, T = x.shape
    xT = jnp.transpose(x, (0, 2, 1))                                  # (B, T, D)
    y = jnp.einsum('btd,ed->bte', xT, Wl, precision='highest') + bl
    z = jnp.transpose(y, (0, 2, 1))                                   # (B, D, T)
    z = jnp.maximum(z, 0.0)
    mean = jnp.mean(z, axis=(0, 2), keepdims=True)
    var = jnp.mean((z - mean) ** 2, axis=(0, 2), keepdims=True)
    z = (z - mean) / jnp.sqrt(var + 1e-5)
    z = z * gamma[None, :, None] + beta[None, :, None]
    zp = jnp.pad(z, ((0, 0), (0, 0), (K // 2 - 1, K // 2)), mode='reflect')
    y2 = jnp.zeros((B, D, T), jnp.float32)
    for k in range(K):
        y2 = y2 + jnp.einsum('oi,bit->bot', Wc[:, :, k], zp[:, :, k:k + T],
                             precision='highest')
    y2 = y2 + bc[None, :, None]
    return x + y2


def _make_params(key, D, K):
    kwl, kbl, kg, kb2, kwc, kbc = jax.random.split(key, 6)
    lin_bound = 1.0 / np.sqrt(D)
    Wl = jax.random.uniform(kwl, (D, D), jnp.float32, -lin_bound, lin_bound)
    bl = jax.random.uniform(kbl, (D,), jnp.float32, -lin_bound, lin_bound)
    gamma = 1.0 + 0.1 * jax.random.normal(kg, (D,), jnp.float32)
    beta = 0.1 * jax.random.normal(kb2, (D,), jnp.float32)
    conv_bound = 1.0 / np.sqrt(D * K)
    Wc = jax.random.uniform(kwc, (D, D, K), jnp.float32, -conv_bound, conv_bound)
    bc = jax.random.uniform(kbc, (D,), jnp.float32, -conv_bound, conv_bound)
    return Wl, bl, gamma, beta, Wc, bc


def _run_case(key, B, D, T, K):
    kx, kp = jax.random.split(key)
    x = jax.random.normal(kx, (B, D, T), dtype=jnp.float32)
    params = _make_params(kp, D, K)

    ref = jax.block_until_ready(reference(x, params, K))

    # Exact-precision path (f32 MXU operands): tight tolerance.
    out_f32 = jax.block_until_ready(
        seqclr_conv_residual_block(x, params, K, mxu_dtype=jnp.float32))
    np.testing.assert_allclose(np.asarray(out_f32), np.asarray(ref),
                               rtol=2e-3, atol=2e-3)

    # Default fast path (bf16 MXU operands, f32 accumulate): bf16-level tolerance.
    out_bf16 = jax.block_until_ready(seqclr_conv_residual_block(x, params, K))
    np.testing.assert_allclose(np.asarray(out_bf16), np.asarray(ref),
                               rtol=2e-2, atol=2e-2)


if __name__ == "__main__":
    key = jax.random.PRNGKey(0)
    k1, k2 = jax.random.split(key)
    # Toy shape (small-D branch: bf16 im2col conv, column-store reflection).
    _run_case(k1, B=2, D=32, T=16, K=8)
    # Lane-aligned shape closer to the module defaults (per-tap conv for D >= 128,
    # permutation-matmul reflection, 'parallel' batch grid).
    _run_case(k2, B=2, D=128, T=128, K=32)
    print("KERNEL_OK")
</pallas_src>

<mosaic_0001>
module attributes {stable_mosaic.version = 11 : i64} {
  func.func @_stats_kernel(%arg0: i32, %arg1: memref<1x32x16xf32, #tpu.memory_space<vmem>>, %arg2: memref<32x32xf32, #tpu.memory_space<vmem>>, %arg3: memref<32x1xf32, #tpu.memory_space<vmem>>, %arg4: memref<32x1xf32, #tpu.memory_space<vmem>>, %arg5: memref<32x1xf32, #tpu.memory_space<vmem>>) attributes {dimension_semantics = [#tpu.dimension_semantics<arbitrary>], iteration_bounds = array<i64: 2>, scalar_prefetch = 0 : i64, scratch_operands = 0 : i64, tpu.core_type = #tpu.core_type<tc>, window_params = [{transform_indices = @transform_0, window_bounds = array<i64: 1, 32, 16>}, {pipeline_mode = #tpu.pipeline_mode<synchronous>, transform_indices = @transform_1, window_bounds = array<i64: 32, 32>}, {pipeline_mode = #tpu.pipeline_mode<synchronous>, transform_indices = @transform_2, window_bounds = array<i64: 32, 1>}, {pipeline_mode = #tpu.pipeline_mode<synchronous>, transform_indices = @transform_3, window_bounds = array<i64: 32, 1>}, {pipeline_mode = #tpu.pipeline_mode<synchronous>, transform_indices = @transform_4, window_bounds = array<i64: 32, 1>}]} {
    %c0_i32 = arith.constant 0 : i32
    %0 = arith.cmpi eq, %arg0, %c0_i32 : i32
    %1 = arith.extui %0 : i1 to i32
    %c0_i32_0 = arith.constant 0 : i32
    %2 = arith.cmpi ne, %1, %c0_i32_0 : i32
    scf.if %2 {
      %cst_18 = arith.constant 0.000000e+00 : f32
      %23 = vector.broadcast %cst_18 : f32 to vector<32x1xf32>
      %c0_19 = arith.constant 0 : index
      %c0_20 = arith.constant 0 : index
      %24 = vector.load %arg4[%c0_19, %c0_20] : memref<32x1xf32, #tpu.memory_space<vmem>>, vector<32x1xf32>
      tpu.vector_store %arg4[%c0_19, %c0_20], %23 {strides = array<i32>} : memref<32x1xf32, #tpu.memory_space<vmem>>, vector<32x1xf32>,
      %cst_21 = arith.constant 0.000000e+00 : f32
      %25 = vector.broadcast %cst_21 : f32 to vector<32x1xf32>
      %c0_22 = arith.constant 0 : index
      %c0_23 = arith.constant 0 : index
      %26 = vector.load %arg5[%c0_22, %c0_23] : memref<32x1xf32, #tpu.memory_space<vmem>>, vector<32x1xf32>
      tpu.vector_store %arg5[%c0_22, %c0_23], %25 {strides = array<i32>} : memref<32x1xf32, #tpu.memory_space<vmem>>, vector<32x1xf32>,
    } else {
    }
    %c0 = arith.constant 0 : index
    %c0_1 = arith.constant 0 : index
    %c0_2 = arith.constant 0 : index
    %3 = vector.load %arg1[%c0, %c0_1, %c0_2] : memref<1x32x16xf32, #tpu.memory_space<vmem>>, vector<1x32x16xf32>
    %4 = vector.shape_cast %3 : vector<1x32x16xf32> to vector<32x16xf32>
    %c0_3 = arith.constant 0 : index
    %c0_4 = arith.constant 0 : index
    %5 = vector.load %arg2[%c0_3, %c0_4] : memref<32x32xf32, #tpu.memory_space<vmem>>, vector<32x32xf32>
    %cst = arith.constant dense<0.000000e+00> : vector<32x16xf32>
    %6 = tpu.matmul %5, %4, %cst {dimension_numbers = #tpu.dot_dimension_numbers<[1], [0], [0], [1], [0, 0, 1, 1], [], []>} : vector<32x32xf32>, vector<32x16xf32>, vector<32x16xf32> -> vector<32x16xf32>
    %c0_5 = arith.constant 0 : index
    %c0_6 = arith.constant 0 : index
    %7 = vector.load %arg3[%c0_5, %c0_6] : memref<32x1xf32, #tpu.memory_space<vmem>>, vector<32x1xf32>
    %8 = vector.broadcast %7 : vector<32x1xf32> to vector<32x16xf32>
    %9 = arith.addf %6, %8 : vector<32x16xf32>
    %cst_7 = arith.constant 0.000000e+00 : f32
    %10 = vector.broadcast %cst_7 : f32 to vector<32x16xf32>
    %11 = arith.maximumf %9, %10 : vector<32x16xf32>
    %c0_8 = arith.constant 0 : index
    %c0_9 = arith.constant 0 : index
    %12 = vector.load %arg4[%c0_8, %c0_9] : memref<32x1xf32, #tpu.memory_space<vmem>>, vector<32x1xf32>
    %cst_10 = arith.constant dense<0.000000e+00> : vector<32xf32>
    %13 = vector.multi_reduction <add>, %11, %cst_10 [1] : vector<32x16xf32> to vector<32xf32>
    %14 = vector.shape_cast %13 : vector<32xf32> to vector<32x1xf32>
    %15 = arith.addf %12, %14 : vector<32x1xf32>
    %c0_11 = arith.constant 0 : index
    %c0_12 = arith.constant 0 : index
    %16 = vector.load %arg4[%c0_11, %c0_12] : memref<32x1xf32, #tpu.memory_space<vmem>>, vector<32x1xf32>
    tpu.vector_store %arg4[%c0_11, %c0_12], %15 {strides = array<i32>} : memref<32x1xf32, #tpu.memory_space<vmem>>, vector<32x1xf32>,
    %c0_13 = arith.constant 0 : index
    %c0_14 = arith.constant 0 : index
    %17 = vector.load %arg5[%c0_13, %c0_14] : memref<32x1xf32, #tpu.memory_space<vmem>>, vector<32x1xf32>
    %18 = arith.mulf %11, %11 : vector<32x16xf32>
    %cst_15 = arith.constant dense<0.000000e+00> : vector<32xf32>
    %19 = vector.multi_reduction <add>, %18, %cst_15 [1] : vector<32x16xf32> to vector<32xf32>
    %20 = vector.shape_cast %19 : vector<32xf32> to vector<32x1xf32>
    %21 = arith.addf %17, %20 : vector<32x1xf32>
    %c0_16 = arith.constant 0 : index
    %c0_17 = arith.constant 0 : index
    %22 = vector.load %arg5[%c0_16, %c0_17] : memref<32x1xf32, #tpu.memory_space<vmem>>, vector<32x1xf32>
    tpu.vector_store %arg5[%c0_16, %c0_17], %21 {strides = array<i32>} : memref<32x1xf32, #tpu.memory_space<vmem>>, vector<32x1xf32>,
    return
  }
  func.func @transform_0(%arg0: i32) -> (i32, i32, i32) {
    %c0_i32 = arith.constant 0 : i32
    %c0_i32_0 = arith.constant 0 : i32
    %c0_i32_1 = arith.constant 0 : i32
    return %arg0, %c0_i32, %c0_i32_0 : i32, i32, i32
  }
  func.func @transform_1(%arg0: i32) -> (i32, i32) {
    %c0_i32 = arith.constant 0 : i32
    %c0_i32_0 = arith.constant 0 : i32
    %c0_i32_1 = arith.constant 0 : i32
    return %c0_i32, %c0_i32_0 : i32, i32
  }
  func.func @transform_2(%arg0: i32) -> (i32, i32) {
    %c0_i32 = arith.constant 0 : i32
    %c0_i32_0 = arith.constant 0 : i32
    %c0_i32_1 = arith.constant 0 : i32
    return %c0_i32, %c0_i32_0 : i32, i32
  }
  func.func @transform_3(%arg0: i32) -> (i32, i32) {
    %c0_i32 = arith.constant 0 : i32
    %c0_i32_0 = arith.constant 0 : i32
    %c0_i32_1 = arith.constant 0 : i32
    return %c0_i32, %c0_i32_0 : i32, i32
  }
  func.func @transform_4(%arg0: i32) -> (i32, i32) {
    %c0_i32 = arith.constant 0 : i32
    %c0_i32_0 = arith.constant 0 : i32
    %c0_i32_1 = arith.constant 0 : i32
    return %c0_i32, %c0_i32_0 : i32, i32
  }
}

</mosaic_0001>

<bundles_post_ra>
// kernel: tpu_custom_call.1
= control target key start
LH: loop header
LB: loop body
LE: loop exit
PB: predicated region body
PF: predicated region fallthrough
CT: control target
= control target key end

     0   :  { %s507_s15 = smov 0   ;;  %s633_s0 = inlined_call_operand.vmem [shape: f32[2,32,16], index: 0, kind: input, shape index: {}]   ;;  %s634_s1 = inlined_call_operand.vmem [shape: f32[32,32], index: 1, kind: input, shape index: {}]   ;;  %s635_s2 = inlined_call_operand.vmem [shape: f32[32,1], index: 2, kind: input, shape index: {}]   ;;  %s636_s3 = inlined_call_operand.vmem [shape: f32[32,1], index: 3, kind: output, shape index: {0}]   ;;  %s637_s4 = inlined_call_operand.vmem [shape: f32[32,1], index: 4, kind: output, shape index: {1}]  }
   0x1 LB: > { %s416_s16 = sadd.s32 4294967295, %s478_s15   ;;  %p419_p0 = scmp.ge.s32.totalorder %s478_s15, 1  ;;  %s478_s15 = sphi %s507_s15, %s15_s15  }
   0x2   : > { %p155_p1 = scmp.lt.s32.totalorder %s478_s15, 3 }
   0x4   : > { %p156_p2 = pnand %p419_p0, %p155_p1 }
   0x5   : > { %p176_p3 = scmp.lt.s32.totalorder (!%p156_p2), %s416_s16, 1  ;;  %p422_p4 = scmp.ne.s32.totalorder (!%p156_p2), %s416_s16, 0 }
   0x6   : > { %159 = sbr.rel (%p156_p2) target bundleno = 387 (0x183), region = 32 }
   0xb   : > { %s177_s17 = scalar_select %p176_p3, %s416_s16, 1 }
   0xc   : > { %184 = sbr.rel (%p422_p4) target bundleno = 22 (0x16), region = 36 }
   0xd   : > { %s429_s18 = sshll.u32 %s177_s17, 5 }
   0xe   : > { %s180_s21 = scalar_lea.vmem %s633_s0, %s429_s18 }
  0x11   : > { %vm185_vm0 = vcmask 7168   ;;  %v480_v0 = vmov 0.0  }
  0x12   : > { %186 = vst.msk [vmem:[%s636_s3] sm:$0xff] %vm185_vm0, %v480_v0  ;;  %187 = vst.msk [vmem:[%s636_s3 + $0x8] sm:$0xff] %vm185_vm0, %v480_v0 }
  0x13   : > { %188 = vst.msk [vmem:[%s636_s3 + $0x10] sm:$0xff] %vm185_vm0, %v480_v0  ;;  %189 = vst.msk [vmem:[%s636_s3 + $0x18] sm:$0xff] %vm185_vm0, %v480_v0 }
  0x14   : > { %190 = vst.msk [vmem:[%s637_s4] sm:$0xff] %vm185_vm0, %v480_v0  ;;  %191 = vst.msk [vmem:[%s637_s4 + $0x8] sm:$0xff] %vm185_vm0, %v480_v0 }
  0x15   : > { %192 = vst.msk [vmem:[%s637_s4 + $0x10] sm:$0xff] %vm185_vm0, %v480_v0  ;;  %193 = vst.msk [vmem:[%s637_s4 + $0x18] sm:$0xff] %vm185_vm0, %v480_v0 }
  0x16 PF: > { %v197_v1 = vld [vmem:[%s180_s21 + $0x18] sm:$0xff]  ;;  %v196_v2 = vld [vmem:[%s180_s21 + $0x10] sm:$0xff]  ;;  %v195_v3 = vld [vmem:[%s180_s21 + $0x8] sm:$0xff]  ;;  %vm226_vm1 = vcmask 261120   ;;  %v481_v11 = vmov 0   ;;  %vm332_vm2 = vcmask 130048  }
  0x17   : > { %438 = vmatprep.subr.mxu0 %v197_v1  ;;  %452 = vmatprep.subr.mxu1 %v197_v1  ;;  %v194_v4 = vld [vmem:[%s180_s21] sm:$0xff]  ;;  %v200_v6 = vld [vmem:[%s634_s1 + $0x10] sm:$0xff]  ;;  %v199_v7 = vld [vmem:[%s634_s1 + $0x8] sm:$0xff]  ;;  %vm349_vm3 = vcmask 7168  }
  0x18   : > { %439 = vmatpush3.msra.mxu0 %v197_v1  ;;  %456 = vmatpush3.msra.mxu1 %v197_v1  ;;  %v198_v5 = vld [vmem:[%s634_s1] sm:$0xff]  ;;  %v201_v8 = vld [vmem:[%s634_s1 + $0x18] sm:$0xff]  ;;  %v204_v9 = vld [vmem:[%s635_s2 + $0x10] sm:$0xff] }
  0x19   : > { %440 = vmatprep.subr.mxu0 %v196_v2  ;;  %453 = vmatprep.subr.mxu1 %v196_v2  ;;  %v202_v10 = vld [vmem:[%s635_s2] sm:$0xff]  ;;  %v205_v12 = vld [vmem:[%s635_s2 + $0x18] sm:$0xff]  ;;  %v203_v13 = vld [vmem:[%s635_s2 + $0x8] sm:$0xff] }
  0x1a   : > { %441 = vmatpush3.msra.mxu0 %v196_v2  ;;  %457 = vmatpush3.msra.mxu1 %v196_v2  ;;  %v331_v42 = vld [vmem:[%s636_s3 + $0x18] sm:$0xff]  ;;  %v329_v43 = vld [vmem:[%s636_s3 + $0x8] sm:$0xff]  ;;  %v328_v49 = vld [vmem:[%s636_s3] sm:$0xff] }
  0x1b   : > { %442 = vmatprep.subr.mxu0 %v195_v3  ;;  %454 = vmatprep.subr.mxu1 %v195_v3  ;;  %v354_v48 = vld [vmem:[%s637_s4] sm:$0xff]  ;;  %v330_v55 = vld [vmem:[%s636_s3 + $0x10] sm:$0xff]  ;;  %v355_v60 = vld [vmem:[%s637_s4 + $0x8] sm:$0xff] }
  0x1c   : > { %443 = vmatpush3.msra.mxu0 %v195_v3  ;;  %458 = vmatpush3.msra.mxu1 %v195_v3  ;;  %v356_v54 = vld [vmem:[%s637_s4 + $0x10] sm:$0xff]  ;;  %v357_v63 = vld [vmem:[%s637_s4 + $0x18] sm:$0xff] }
  0x1d   : > { %444 = vmatprep.subr.mxu0 %v194_v4  ;;  %455 = vmatprep.subr.mxu1 %v194_v4 }
  0x1e   : > { %445 = vmatpush3.msra.mxu0 %v194_v4  ;;  %459 = vmatpush3.msra.mxu1 %v194_v4 }
  0x1f   : > { %446 = vmatprep.mubr.msk.f32.mxu0 %vm226_vm1, %v198_v5  ;;  %449 = vmatprep.mubr.msk.f32.mxu1 %vm226_vm1, %v200_v6 }
  0x20   : > { %447 = vmatmul.mubr.msk.f32.vlgmr.msra.gmra.mxu0 %vm226_vm1, %v199_v7  ;;  %450 = vmatmul.mubr.msk.f32.vlgmr.msra.gmra.mxu1 %vm226_vm1, %v201_v8 }
  0x21   : > { %471 = vset.pattern.permute.xlu1 %v481_v11  ;;  %470 = vset.pattern.permute.xlu0 %v481_v11 }
  0x22   : > { %218 = vperm.xlu1 %471, %v204_v9   ;;  %208 = vperm.xlu0 %470, %v202_v10  }
  0x26   : > { %223 = vperm.xlu1 %471, %v205_v12   ;;  %213 = vperm.xlu0 %470, %v203_v13  }
  0x9d   : > { %v209_v14 = vpop.permute.xlu0 %208  ;;  %v219_v15 = vpop.permute.xlu1 %218 }
  0xa1   : > { %v214_v16 = vpop.permute.xlu0 %213  ;;  %v224_v17 = vpop.permute.xlu1 %223 }
  0xe0   : > { %v448_v18 = vpop.f32.mrf.mxu0  ;;  %v451_v19 = vpop.f32.mrf.mxu1 }
  0xe1   : > { %v311_v20 = vadd.f32 %v448_v18, %v214_v16  ;;  %v321_v21 = vadd.f32 %v451_v19, %v224_v17 }
  0xe2   : > { %v305_v22 = vpop.f32.mrf.mxu0  ;;  %v315_v23 = vpop.f32.mrf.mxu1 }
  0xe3   : > { %v325_v24 = vmax.f32 %v311_v20, 0.0  ;;  %v327_v25 = vmax.f32 %v321_v21, 0.0  ;;  %v306_v26 = vadd.f32 %v305_v22, %v209_v14  ;;  %v316_v27 = vadd.f32 %v315_v23, %v219_v15 }
  0xe5   : > { %v324_v28 = vmax.f32 %v306_v26, 0.0  ;;  %v326_v29 = vmax.f32 %v316_v27, 0.0  ;;  %v342_v30 = vsel %vm332_vm2, %v327_v25, 0.0  ;;  %v336_v31 = vsel %vm332_vm2, %v325_v24, 0.0 }
  0xe6   : > { %343 = vadd.xlane.f32.xlu0 %v342_v30  ;;  %337 = vadd.xlane.f32.xlu1 %v336_v31  ;;  %v359_v38 = vmul.f32 %v325_v24, %v325_v24  ;;  %v361_v40 = vmul.f32 %v327_v25, %v327_v25 }
  0xe7   : > { %v358_v32 = vmul.f32 %v324_v28, %v324_v28  ;;  %v333_v34 = vsel %vm332_vm2, %v324_v28, 0.0  ;;  %v360_v35 = vmul.f32 %v326_v29, %v326_v29  ;;  %v339_v37 = vsel %vm332_vm2, %v326_v29, 0.0 }
  0xe8   : > { %v365_v39 = vsel %vm332_vm2, %v359_v38, 0.0  ;;  %v371_v41 = vsel %vm332_vm2, %v361_v40, 0.0 }
  0xe9   : > { %v362_v33 = vsel %vm332_vm2, %v358_v32, 0.0  ;;  %v368_v36 = vsel %vm332_vm2, %v360_v35, 0.0 }
  0xea   : > { %363 = vadd.xlane.f32.xlu1 %v362_v33  ;;  %334 = vadd.xlane.f32.xlu0 %v333_v34 }
  0xee   : > { %369 = vadd.xlane.f32.xlu1 %v368_v36  ;;  %340 = vadd.xlane.f32.xlu0 %v339_v37 }
  0xf2   : > { %366 = vadd.xlane.f32.xlu0 %v365_v39 }
  0xf6   : > { %372 = vadd.xlane.f32.xlu0 %v371_v41 }
 0x16f   : > { %v344_v44 = vpop.xlane.xlu0 %343  ;;  %v338_v45 = vpop.xlane.xlu1 %337 }
 0x170   : > { %v348_v46 = vadd.f32 %v344_v44, %v331_v42  ;;  %v346_v47 = vadd.f32 %v338_v45, %v329_v43 }
 0x172   : > { %353 = vst.msk [vmem:[%s636_s3 + $0x18] sm:$0xff] %vm349_vm3, %v348_v46  ;;  %351 = vst.msk [vmem:[%s636_s3 + $0x8] sm:$0xff] %vm349_vm3, %v346_v47 }
 0x173   : > { %v364_v50 = vpop.xlane.xlu1 %363  ;;  %v335_v51 = vpop.xlane.xlu0 %334 }
 0x174   : > { %v374_v52 = vadd.f32 %v364_v50, %v354_v48  ;;  %v345_v53 = vadd.f32 %v335_v51, %v328_v49 }
 0x176   : > { %378 = vst.msk [vmem:[%s637_s4] sm:$0xff] %vm349_vm3, %v374_v52  ;;  %350 = vst.msk [vmem:[%s636_s3] sm:$0xff] %vm349_vm3, %v345_v53 }
 0x177   : > { %v370_v56 = vpop.xlane.xlu1 %369  ;;  %v341_v57 = vpop.xlane.xlu0 %340 }
 0x178   : > { %v376_v58 = vadd.f32 %v370_v56, %v356_v54  ;;  %v347_v59 = vadd.f32 %v341_v57, %v330_v55 }
 0x17a   : > { %380 = vst.msk [vmem:[%s637_s4 + $0x10] sm:$0xff] %vm349_vm3, %v376_v58  ;;  %352 = vst.msk [vmem:[%s636_s3 + $0x10] sm:$0xff] %vm349_vm3, %v347_v59 }
 0x17b   : > { %v367_v61 = vpop.xlane.xlu0 %366 }
 0x17c   : > { %v375_v62 = vadd.f32 %v367_v61, %v355_v60 }
 0x17e   : > { %379 = vst.msk [vmem:[%s637_s4 + $0x8] sm:$0xff] %vm349_vm3, %v375_v62 }
 0x17f   : > { %v373_v0 = vpop.xlane.xlu0 %372 }
 0x180   : > { %v377_v1 = vadd.f32 %v373_v0, %v357_v63 }
 0x182   : > { %381 = vst.msk [vmem:[%s637_s4 + $0x18] sm:$0xff] %vm349_vm3, %v377_v1 }
 0x183 PF: > { %s15_s15 = sadd.s32 1, %s478_s15  }
 0x184   : > { %p12_p5 = scmp.ge.s32.totalorder %s15_s15, 4  }
 0x186   :  { %14 = sbr.rel (!%p12_p5) target bundleno = 1 (0x1), region = 70 }

</bundles_post_ra>
